<compile_context>
chip_gen: v6e
topology: v6e:2x2x1
jax: 0.10.0
libtpu: 0.0.40
codegen_flags: <defaults>
</compile_context>

<pallas_src>
import jax
import jax.numpy as jnp
from jax.experimental import pallas as pl
from jax.experimental.pallas import tpu as pltpu

_LANES = 128            # lane width (last dim of every block)
_MAX_BLOCK_ROWS = 2048  # (2048, 128) f32 = 1 MiB per array per block
                        # -> 2 in + 2 out, double-buffered = 8 MiB, fits v7x


def _student_prior_kernel(logvar_ref, logdf_ref, scale_out_ref, df_out_ref):
    # Purely elementwise: EUP exp + one VPU min, fully in VMEM.
    scale_out_ref[...] = jnp.exp(jnp.float32(0.5) * logvar_ref[...])
    # exp(x) + 2.1 >= 2.1, so the lower clamp of the original module is a no-op.
    df_out_ref[...] = jnp.minimum(
        jnp.exp(logdf_ref[...]) + jnp.float32(2.1), jnp.float32(50.0)
    )


def learnable_student_prior_forward(mu_prior, logvar_prior, logdf_prior):
    """Pallas equivalent of LearnableStudentPrior.forward().

    Args:
      mu_prior, logvar_prior, logdf_prior: f32[embed_dim]
    Returns:
      (mu_prior, scale_prior, df_prior): each f32[embed_dim]
    """
    embed_dim = mu_prior.shape[0]

    logvar = logvar_prior.astype(jnp.float32)
    logdf = logdf_prior.astype(jnp.float32)

    # ---- lane-dense 2-D layout: pad to a multiple of 128 lanes -------------
    padded = pl.cdiv(embed_dim, _LANES) * _LANES
    if padded != embed_dim:
        pad = padded - embed_dim
        logvar = jnp.pad(logvar, (0, pad))
        logdf = jnp.pad(logdf, (0, pad))
    rows = padded // _LANES

    # ---- pick block rows: single full block when small, tiled when large --
    if rows <= _MAX_BLOCK_ROWS:
        block_rows = rows
    else:
        block_rows = _MAX_BLOCK_ROWS
        padded_rows = pl.cdiv(rows, block_rows) * block_rows
        if padded_rows != rows:
            extra = (padded_rows - rows) * _LANES
            logvar = jnp.pad(logvar, (0, extra))
            logdf = jnp.pad(logdf, (0, extra))
        rows = padded_rows

    logvar2d = logvar.reshape(rows, _LANES)
    logdf2d = logdf.reshape(rows, _LANES)
    grid = (rows // block_rows,)

    block_spec = pl.BlockSpec((block_rows, _LANES), lambda i: (i, 0))

    scale2d, df2d = pl.pallas_call(
        _student_prior_kernel,
        out_shape=(
            jax.ShapeDtypeStruct((rows, _LANES), jnp.float32),
            jax.ShapeDtypeStruct((rows, _LANES), jnp.float32),
        ),
        grid=grid,
        in_specs=[block_spec, block_spec],
        out_specs=(block_spec, block_spec),
        compiler_params=pltpu.CompilerParams(
            dimension_semantics=("parallel",),
        ),
    )(logvar2d, logdf2d)

    scale_prior = scale2d.reshape(-1)[:embed_dim]
    df_prior = df2d.reshape(-1)[:embed_dim]

    # mu_prior is an identity in the original module: return it directly
    # instead of round-tripping it through the kernel.
    return mu_prior, scale_prior, df_prior


if __name__ == "__main__":
    embed_dim = 128  # lane-aligned; module only needs a 1-D embed_dim

    # Deterministic "parameter" init (module uses zeros; we use small random
    # values from PRNGKey(0) so the exp/min path is actually exercised).
    key = jax.random.PRNGKey(0)
    k_mu, k_lv, k_ldf = jax.random.split(key, 3)
    mu_prior = jax.random.normal(k_mu, (embed_dim,), dtype=jnp.float32) * 0.1
    logvar_prior = jax.random.normal(k_lv, (embed_dim,), dtype=jnp.float32) * 0.5
    logdf_prior = jax.random.normal(k_ldf, (embed_dim,), dtype=jnp.float32) * 2.0

    mu_out, scale_out, df_out = jax.block_until_ready(
        learnable_student_prior_forward(mu_prior, logvar_prior, logdf_prior)
    )

    # Reference check (plain JAX) for the original forward semantics.
    df_ref = jnp.clip(jnp.exp(logdf_prior) + 2.1, 2.1, 50.0)
    scale_ref = jnp.exp(0.5 * logvar_prior)
    assert jnp.allclose(mu_out, mu_prior, atol=1e-6)
    assert jnp.allclose(scale_out, scale_ref, atol=1e-5, rtol=1e-5)
    assert jnp.allclose(df_out, df_ref, atol=1e-4, rtol=1e-5)

    print("KERNEL_OK")
</pallas_src>

<mosaic_0001>
module attributes {stable_mosaic.version = 11 : i64} {
  func.func @_student_prior_kernel(%arg0: i32, %arg1: memref<1x128xf32, #tpu.memory_space<vmem>>, %arg2: memref<1x128xf32, #tpu.memory_space<vmem>>, %arg3: memref<1x128xf32, #tpu.memory_space<vmem>>, %arg4: memref<1x128xf32, #tpu.memory_space<vmem>>) attributes {dimension_semantics = [#tpu.dimension_semantics<parallel>], iteration_bounds = array<i64: 1>, scalar_prefetch = 0 : i64, scratch_operands = 0 : i64, tpu.core_type = #tpu.core_type<tc>, window_params = [{transform_indices = @transform_0, window_bounds = array<i64: 1, 128>}, {transform_indices = @transform_1, window_bounds = array<i64: 1, 128>}, {transform_indices = @transform_2, window_bounds = array<i64: 1, 128>}, {transform_indices = @transform_3, window_bounds = array<i64: 1, 128>}]} {
    %c0 = arith.constant 0 : index
    %c0_0 = arith.constant 0 : index
    %0 = vector.load %arg1[%c0, %c0_0] : memref<1x128xf32, #tpu.memory_space<vmem>>, vector<1x128xf32>
    %cst = arith.constant 5.000000e-01 : f32
    %1 = vector.broadcast %cst : f32 to vector<1x128xf32>
    %2 = arith.mulf %1, %0 : vector<1x128xf32>
    %3 = math.exp %2 : vector<1x128xf32>
    %c0_1 = arith.constant 0 : index
    %c0_2 = arith.constant 0 : index
    %4 = vector.load %arg3[%c0_1, %c0_2] : memref<1x128xf32, #tpu.memory_space<vmem>>, vector<1x128xf32>
    tpu.vector_store %arg3[%c0_1, %c0_2], %3 {strides = array<i32>} : memref<1x128xf32, #tpu.memory_space<vmem>>, vector<1x128xf32>,
    %c0_3 = arith.constant 0 : index
    %c0_4 = arith.constant 0 : index
    %5 = vector.load %arg2[%c0_3, %c0_4] : memref<1x128xf32, #tpu.memory_space<vmem>>, vector<1x128xf32>
    %6 = math.exp %5 : vector<1x128xf32>
    %cst_5 = arith.constant 2.100000e+00 : f32
    %7 = vector.broadcast %cst_5 : f32 to vector<1x128xf32>
    %8 = arith.addf %6, %7 : vector<1x128xf32>
    %cst_6 = arith.constant 5.000000e+01 : f32
    %9 = vector.broadcast %cst_6 : f32 to vector<1x128xf32>
    %10 = arith.minimumf %8, %9 : vector<1x128xf32>
    %c0_7 = arith.constant 0 : index
    %c0_8 = arith.constant 0 : index
    %11 = vector.load %arg4[%c0_7, %c0_8] : memref<1x128xf32, #tpu.memory_space<vmem>>, vector<1x128xf32>
    tpu.vector_store %arg4[%c0_7, %c0_8], %10 {strides = array<i32>} : memref<1x128xf32, #tpu.memory_space<vmem>>, vector<1x128xf32>,
    return
  }
  func.func @transform_0(%arg0: i32) -> (i32, i32) {
    %c0_i32 = arith.constant 0 : i32
    %c0_i32_0 = arith.constant 0 : i32
    return %arg0, %c0_i32 : i32, i32
  }
  func.func @transform_1(%arg0: i32) -> (i32, i32) {
    %c0_i32 = arith.constant 0 : i32
    %c0_i32_0 = arith.constant 0 : i32
    return %arg0, %c0_i32 : i32, i32
  }
  func.func @transform_2(%arg0: i32) -> (i32, i32) {
    %c0_i32 = arith.constant 0 : i32
    %c0_i32_0 = arith.constant 0 : i32
    return %arg0, %c0_i32 : i32, i32
  }
  func.func @transform_3(%arg0: i32) -> (i32, i32) {
    %c0_i32 = arith.constant 0 : i32
    %c0_i32_0 = arith.constant 0 : i32
    return %arg0, %c0_i32 : i32, i32
  }
}

</mosaic_0001>

<bundles_post_ra>
// kernel: tpu_custom_call.1
= control target key start
LH: loop header
LB: loop body
LE: loop exit
PB: predicated region body
PF: predicated region fallthrough
CT: control target
= control target key end

     0   :  { %9 = vsyncpa [#allocation3], 0  ;;  %s175_s0 = inlined_call_operand.hbm [shape: f32[1,128], index: 0, kind: input, shape index: {}]   ;;  %s176_s1 = inlined_call_operand.vmem [shape: f32[1,128], index: 1, kind: input, shape index: {}]   ;;  %s177_s2 = inlined_call_operand.hbm [shape: f32[1,128], index: 2, kind: output, shape index: {0}]   ;;  %s178_s3 = inlined_call_operand.hbm [shape: f32[1,128], index: 3, kind: output, shape index: {1}]  }
   0x1   :  { %10 = vsyncpa [#allocation4], 0 }
   0x2   :  { %11 = vsyncpa [#allocation7], 0  ;;  %s140_s12 = smov [#allocation2]  }
   0x3   :  { %s18_s13 = sshll.u32 %s140_s12, 4  ;;  %s19_s13 = int_to_ptr.vmem [resolvable:$true] %s18_s13 }
   0x4   :  { %s82_s14 = scalar_lea.vmem %s19_s13, 16  ;;  %s86_s15 = scalar_lea.vmem %s19_s13, 32 }
   0x5   :  { %p83_p0 = scmp.ne.s32.totalorder %s19_s13, %s82_s14  ;;  %p87_p1 = scmp.lt.s32.totalorder %s19_s13, %s19_s13 }
   0x6   :  { %p88_p2 = scmp.lt.s32.totalorder %s86_s15, %s82_s14 }
   0x8   :  { %p89_p3 = por %p88_p2, %p87_p1 }
   0xa   :  { %p90_p4 = pnand %p89_p3, %p83_p0 }
   0xc   :  { %93 = shalt.err (!%p90_p4)
}
   0xd   :  { %21 = dma.hbm_to_vmem [thread:$0]  %s175_s0, 16, %s19_s13, [#allocation3]  }
   0xe   :  { %134 = dma.done.wait [#allocation3], 16  }
   0xf   :  { %135 = vsyncadd [#allocation3], 4294967280  ;;  %v27_v0 = vld [vmem:[#allocation2] sm:$0x1]  ;;  %s141_s20 = smov [#allocation5]   ;;  %s142_s22 = smov [#allocation6]  }
  0x10   :  { %v32_v1 = vld [vmem:[%s176_s1] sm:$0x1]  ;;  %v28_v2 = vmul.f32 0.5, %v27_v0  ;;  %s44_s21 = sshll.u32 %s141_s20, 4  ;;  %s54_s23 = sshll.u32 %s142_s22, 4  ;;  %s45_s21 = int_to_ptr.vmem [resolvable:$true] %s44_s21  ;;  %s55_s23 = int_to_ptr.vmem [resolvable:$true] %s54_s23 }
  0x11   :  { %v33_v3 = vmul.f32 1.442695, %v32_v1  ;;  %s94_s0 = scalar_lea.vmem %s45_s21, 16  ;;  %s98_s24 = scalar_lea.vmem %s45_s21, 32 }
  0x12   :  { %v29_v4 = vmul.f32 1.442695, %v28_v2  ;;  %p95_p5 = scmp.ne.s32.totalorder %s45_s21, %s94_s0  ;;  %p99_p6 = scmp.lt.s32.totalorder %s45_s21, %s45_s21 }
  0x13   :  { %70 = vpow2.f32 %v33_v3  ;;  %p100_p7 = scmp.lt.s32.totalorder %s98_s24, %s94_s0 }
  0x14   :  { %72 = vpow2.f32 %v29_v4 }
  0x15   :  { %p101_p8 = por %p100_p7, %p99_p6 }
  0x17   :  { %p102_p9 = pnand %p101_p8, %p95_p5 }
  0x20   :  { %v71_v5 = vpop.eup %70 }
  0x21   :  { %v35_v6 = vadd.f32 2.1, %v71_v5  ;;  %v73_v7 = vpop.eup %72 }
  0x22   :  { %31 = vst [vmem:[#allocation5] sm:$0x1] %v73_v7 }
  0x23   :  { %v36_v8 = vmin.f32 %v35_v6, 50.0 }
  0x24   :  { %105 = shalt.err (!%p102_p9)
}
  0x25   :  { %47 = dma.vmem_to_hbm [thread:$0]  %s45_s21, 16, %s177_s2, [#allocation4]   ;;  %37 = vst [vmem:[#allocation6] sm:$0x1] %v36_v8 }
  0x26   :  { %s114_s26 = scalar_lea.vmem %s55_s23, 16  ;;  %s118_s27 = scalar_lea.vmem %s55_s23, 32 }
  0x27   :  { %p115_p10 = scmp.ne.s32.totalorder %s55_s23, %s114_s26  ;;  %p119_p11 = scmp.lt.s32.totalorder %s55_s23, %s55_s23 }
  0x28   :  { %p120_p12 = scmp.lt.s32.totalorder %s118_s27, %s114_s26 }
  0x2a   :  { %p121_p13 = por %p120_p12, %p119_p11 }
  0x2c   :  { %p122_p0 = pnand %p121_p13, %p115_p10 }
  0x2e   :  { %125 = shalt.err (!%p122_p0)
}
  0x2f   :  { %57 = dma.vmem_to_hbm [thread:$0]  %s55_s23, 16, %s178_s3, [#allocation7]  }
  0x30   :  { %136 = dma.done.wait [#allocation4], 16  }
  0x31   :  { %137 = vsyncadd [#allocation4], 4294967280 }
  0x32   :  { %138 = dma.done.wait [#allocation7], 16  }
  0x33   :  { %139 = vsyncadd [#allocation7], 4294967280 }
  0x34   :  { %64 = vsyncpa [#allocation3], 1 }
  0x35   :  { %65 = vsyncpa [#allocation4], 1 }
  0x36   :  { %66 = vsyncpa [#allocation7], 1 }

</bundles_post_ra>
